<compile_context>
chip_gen: v7x
topology: tpu7x:2x2x1
jax: 0.10.0
libtpu: 0.0.40
codegen_flags: <defaults>
</compile_context>

<pallas_src>
import functools

import numpy as np
import jax
import jax.numpy as jnp
from jax.experimental import pallas as pl
from jax.experimental.pallas import tpu as pltpu


def _fuse_kernel(x_s_ref, x_f_ref, w_ref, shift_ref, out_ref, *, rows_s):
    """One grid step = (one batch element, one spatial tile).

    x_s_ref   : (1, C_s*T_s,        TILE_HW) f32  slow pathway (copied through = concat)
    x_f_ref   : (1, C_f*T_f,        TILE_HW) f32  fast pathway, natural NCTHW row order
    w_ref     : (C_out*T_s, C_f*T_f)          f32  block-diagonal conv weight, BN scale folded
    shift_ref : (C_out*T_s, 1)                f32  fused BN shift = beta - mean * scale
    out_ref   : (1, (C_s+C_out)*T_s, TILE_HW) f32
    """
    # Slow-pathway passthrough: one dense contiguous block copy (this IS the channel concat).
    out_ref[0, :rows_s, :] = x_s_ref[0]

    # Entire fused pathway (all output timesteps, all output channels) in ONE MXU matmul,
    # f32 accumulate, BN shift + ReLU in f32, then ONE dense contiguous store.
    acc = jnp.dot(w_ref[...], x_f_ref[0], preferred_element_type=jnp.float32)
    out_ref[0, rows_s:, :] = jnp.maximum(acc + shift_ref[...], 0.0).astype(out_ref.dtype)


def _vmem_limits():
    """Generation-aware VMEM numbers: (vmem_limit_bytes, tile_budget_bytes)."""
    phys = 128 * 1024 * 1024
    try:
        info = pltpu.get_tpu_info()
        phys = int(getattr(info, "vmem_capacity_bytes", phys)) or phys
    except Exception:
        pass
    # ~32 MiB limit on v7x (64 MiB physical per TC), 64 MiB on v5e/v6e (128 MiB physical).
    limit = min(phys // 2, 64 * 1024 * 1024)
    tile_budget = limit // 2          # headroom for weights / compiler scratch
    return limit, tile_budget


def _pick_tile_hw(HW, per_col_bytes, tile_budget, batch):
    """Multiple-of-128 spatial tile fitting the double-buffered VMEM budget.

    Ragged last block (HW % tile != 0) is handled by Pallas via grid = cdiv(HW, tile),
    so there is no silent fall-back to the full spatial extent for sizes like HW=3136.
    """
    cap = max(128, (tile_budget // per_col_bytes) // 128 * 128)
    if HW <= cap:
        tile = HW                                   # full spatial extent (allowed even if %128 != 0)
        if batch < 2 and HW >= 256:                 # v7x megacore: give the 2nd TensorCore work
            tile = ((-(-HW // 2)) + 127) // 128 * 128
    else:
        tile = cap
    return tile


def fuse_fast_to_slow(x_s, x_f, weight, bn_gamma, bn_beta, bn_mean, bn_var,
                      *, alpha, eps=1e-5):
    """x_s: (N, C_s, T_s, H, W), x_f: (N, C_f, T_f, H, W), weight: (C_out, C_f, K, 1, 1)."""
    N, C_s, T_s, H, W = x_s.shape
    _, C_f, T_f, _, _ = x_f.shape
    C_out, _, K, _, _ = weight.shape
    pad = K // 2
    HW = H * W
    assert (T_f + 2 * pad - K) // alpha + 1 == T_s

    # ---- glue (XLA side): FREE reshapes only, no relayout / cast HBM passes -------------
    x_s_r = x_s.reshape(N, C_s * T_s, HW).astype(jnp.float32)
    x_f_r = x_f.reshape(N, C_f * T_f, HW).astype(jnp.float32)

    # ---- fold BN + temporal taps into one block-diagonal weight (host side) -------------
    scale = bn_gamma / jnp.sqrt(bn_var + eps)                        # (C_out,)
    shift = bn_beta - bn_mean * scale                                # (C_out,)
    shift_big = jnp.repeat(shift, T_s).reshape(C_out * T_s, 1).astype(jnp.float32)

    w_scaled = (weight[:, :, :, 0, 0] * scale[:, None, None]).astype(jnp.float32)  # (C_out, C_f, K)
    # 0/1 tap-placement tensor built with numpy (no per-call device scatter chain);
    # out-of-range taps (the zero padding of the temporal conv) simply never get a 1.
    place = np.zeros((T_s, K, T_f), np.float32)
    for t in range(T_s):
        for k in range(K):
            it = t * alpha - pad + k
            if 0 <= it < T_f:
                place[t, k, it] = 1.0
    w_big = jnp.einsum("oak,tki->otai", w_scaled, jnp.asarray(place))  # (C_out, T_s, C_f, T_f)
    w_big = w_big.reshape(C_out * T_s, C_f * T_f)                      # rows: c*T_s + t, cols: c_f*T_f + t_in

    rows_s = C_s * T_s
    rows_f = C_f * T_f
    rows_o = (C_s + C_out) * T_s

    # ---- generation-aware VMEM budget + spatial tiling -----------------------------------
    vmem_limit, tile_budget = _vmem_limits()
    per_col_bytes = 2 * 4 * (rows_s + rows_f + rows_o)               # double-buffered f32 blocks
    tile_hw = _pick_tile_hw(HW, per_col_bytes, tile_budget, N)
    n_hw = pl.cdiv(HW, tile_hw)

    bytes_accessed = 4 * HW * N * (rows_s + rows_f + rows_o) + 4 * (w_big.size + shift_big.size)
    flops = 2 * N * HW * C_out * T_s * C_f * K
    cost = pl.CostEstimate(flops=flops, transcendentals=0, bytes_accessed=bytes_accessed)

    kernel = functools.partial(_fuse_kernel, rows_s=rows_s)

    out = pl.pallas_call(
        kernel,
        out_shape=jax.ShapeDtypeStruct((N, rows_o, HW), jnp.float32),
        grid=(N, n_hw),
        in_specs=[
            pl.BlockSpec((1, rows_s, tile_hw), lambda n, h: (n, 0, h)),
            pl.BlockSpec((1, rows_f, tile_hw), lambda n, h: (n, 0, h)),
            pl.BlockSpec((C_out * T_s, rows_f), lambda n, h: (0, 0)),
            pl.BlockSpec((C_out * T_s, 1), lambda n, h: (0, 0)),
        ],
        out_specs=pl.BlockSpec((1, rows_o, tile_hw), lambda n, h: (n, 0, h)),
        compiler_params=pltpu.CompilerParams(
            dimension_semantics=("parallel", "parallel"),
            vmem_limit_bytes=vmem_limit,
        ),
        cost_estimate=cost,
    )(x_s_r, x_f_r, w_big, shift_big)

    # Same memory order as NCTHW -> this reshape is free.
    x_s_fuse = out.reshape(N, C_s + C_out, T_s, H, W)
    return [x_s_fuse, x_f]


def _reference(x_s, x_f, weight, gamma, beta, mean, var, *, alpha, eps=1e-5):
    """Plain-JAX (f32) reference of the same forward pass, for validation."""
    K = weight.shape[2]
    fuse = jax.lax.conv_general_dilated(
        x_f.astype(jnp.float32), weight.astype(jnp.float32),
        window_strides=(alpha, 1, 1),
        padding=[(K // 2, K // 2), (0, 0), (0, 0)],
        dimension_numbers=("NCDHW", "OIDHW", "NCDHW"),
    )
    s = gamma / jnp.sqrt(var + eps)
    fuse = fuse * s[None, :, None, None, None] + (beta - mean * s)[None, :, None, None, None]
    fuse = jnp.maximum(fuse, 0.0)
    return [jnp.concatenate([x_s.astype(jnp.float32), fuse], axis=1), x_f]


if __name__ == "__main__":
    key = jax.random.PRNGKey(0)
    k1, k2, k3 = jax.random.split(key, 3)

    # Small SlowFast-like shapes: alpha=4, fusion_conv_channel_ratio=2, fusion_kernel=7.
    N, C_f, T_f, H, W = 2, 4, 16, 16, 16
    alpha, K = 4, 7
    C_out = 2 * C_f                      # fast->slow fusion channels
    C_s, T_s = 8, T_f // alpha           # slow pathway

    x_s = jax.random.normal(k1, (N, C_s, T_s, H, W), dtype=jnp.float32)
    x_f = jax.random.normal(k2, (N, C_f, T_f, H, W), dtype=jnp.float32)

    # Deterministic parameter init (Conv3d weight, no bias; BatchNorm3d running stats).
    weight = 0.1 * jax.random.normal(k3, (C_out, C_f, K, 1, 1), dtype=jnp.float32)
    bn_gamma = 1.0 + 0.01 * jnp.arange(C_out, dtype=jnp.float32)
    bn_beta = 0.01 * jnp.arange(C_out, dtype=jnp.float32)
    bn_mean = 0.05 * jnp.arange(C_out, dtype=jnp.float32)
    bn_var = 1.0 + 0.02 * jnp.arange(C_out, dtype=jnp.float32)

    out = fuse_fast_to_slow(x_s, x_f, weight, bn_gamma, bn_beta, bn_mean, bn_var,
                            alpha=alpha)
    jax.block_until_ready(out)

    ref = _reference(x_s, x_f, weight, bn_gamma, bn_beta, bn_mean, bn_var, alpha=alpha)
    assert out[0].shape == (N, C_s + C_out, T_s, H, W)
    assert jnp.allclose(out[0][:, :C_s], ref[0][:, :C_s])                 # passthrough exact
    assert jnp.allclose(out[0], ref[0], atol=5e-2, rtol=5e-2)             # fused channels (MXU precision)
    assert jnp.array_equal(out[1], ref[1])

    print("KERNEL_OK")
</pallas_src>

<mosaic_0001>
module attributes {stable_mosaic.version = 11 : i64} {
  func.func @_fuse_kernel(%arg0: i32, %arg1: i32, %arg2: memref<1x32x256xf32, #tpu.memory_space<vmem>>, %arg3: memref<1x64x256xf32, #tpu.memory_space<vmem>>, %arg4: memref<32x64xf32, #tpu.memory_space<vmem>>, %arg5: memref<32x1xf32, #tpu.memory_space<vmem>>, %arg6: memref<1x64x256xf32, #tpu.memory_space<vmem>>) attributes {dimension_semantics = [#tpu.dimension_semantics<parallel>, #tpu.dimension_semantics<parallel>], iteration_bounds = array<i64: 2, 1>, scalar_prefetch = 0 : i64, scratch_operands = 0 : i64, tpu.core_type = #tpu.core_type<tc>, window_params = [{transform_indices = @transform_0, window_bounds = array<i64: 1, 32, 256>}, {transform_indices = @transform_1, window_bounds = array<i64: 1, 64, 256>}, {pipeline_mode = #tpu.pipeline_mode<synchronous>, transform_indices = @transform_2, window_bounds = array<i64: 32, 64>}, {pipeline_mode = #tpu.pipeline_mode<synchronous>, transform_indices = @transform_3, window_bounds = array<i64: 32, 1>}, {transform_indices = @transform_4, window_bounds = array<i64: 1, 64, 256>}]} {
    %c0 = arith.constant 0 : index
    %c0_0 = arith.constant 0 : index
    %c0_1 = arith.constant 0 : index
    %0 = vector.load %arg2[%c0, %c0_0, %c0_1] : memref<1x32x256xf32, #tpu.memory_space<vmem>>, vector<1x32x256xf32>
    %1 = vector.shape_cast %0 : vector<1x32x256xf32> to vector<32x256xf32>
    %c0_2 = arith.constant 0 : index
    %c0_3 = arith.constant 0 : index
    %c0_4 = arith.constant 0 : index
    %2 = vector.load %arg6[%c0_2, %c0_3, %c0_4] : memref<1x64x256xf32, #tpu.memory_space<vmem>>, vector<1x32x256xf32>
    %3 = vector.shape_cast %2 : vector<1x32x256xf32> to vector<32x256xf32>
    %4 = vector.shape_cast %1 : vector<32x256xf32> to vector<1x32x256xf32>
    tpu.vector_store %arg6[%c0_2, %c0_3, %c0_4], %4 {strides = array<i32>} : memref<1x64x256xf32, #tpu.memory_space<vmem>>, vector<1x32x256xf32>,
    %c0_5 = arith.constant 0 : index
    %c0_6 = arith.constant 0 : index
    %5 = vector.load %arg4[%c0_5, %c0_6] : memref<32x64xf32, #tpu.memory_space<vmem>>, vector<32x64xf32>
    %c0_7 = arith.constant 0 : index
    %c0_8 = arith.constant 0 : index
    %c0_9 = arith.constant 0 : index
    %6 = vector.load %arg3[%c0_7, %c0_8, %c0_9] : memref<1x64x256xf32, #tpu.memory_space<vmem>>, vector<1x64x256xf32>
    %7 = vector.shape_cast %6 : vector<1x64x256xf32> to vector<64x256xf32>
    %cst = arith.constant dense<0.000000e+00> : vector<32x256xf32>
    %8 = tpu.matmul %5, %7, %cst {dimension_numbers = #tpu.dot_dimension_numbers<[1], [0], [0], [1], [0, 0, 1, 1], [], []>} : vector<32x64xf32>, vector<64x256xf32>, vector<32x256xf32> -> vector<32x256xf32>
    %c0_10 = arith.constant 0 : index
    %c0_11 = arith.constant 0 : index
    %9 = vector.load %arg5[%c0_10, %c0_11] : memref<32x1xf32, #tpu.memory_space<vmem>>, vector<32x1xf32>
    %10 = vector.broadcast %9 : vector<32x1xf32> to vector<32x256xf32>
    %11 = arith.addf %8, %10 : vector<32x256xf32>
    %cst_12 = arith.constant 0.000000e+00 : f32
    %12 = vector.broadcast %cst_12 : f32 to vector<32x256xf32>
    %13 = arith.maximumf %11, %12 : vector<32x256xf32>
    %c0_13 = arith.constant 0 : index
    %c32 = arith.constant 32 : index
    %c0_14 = arith.constant 0 : index
    %14 = vector.load %arg6[%c0_13, %c32, %c0_14] : memref<1x64x256xf32, #tpu.memory_space<vmem>>, vector<1x32x256xf32>
    %15 = vector.shape_cast %14 : vector<1x32x256xf32> to vector<32x256xf32>
    %16 = vector.shape_cast %13 : vector<32x256xf32> to vector<1x32x256xf32>
    tpu.vector_store %arg6[%c0_13, %c32, %c0_14], %16 {strides = array<i32>} : memref<1x64x256xf32, #tpu.memory_space<vmem>>, vector<1x32x256xf32>,
    return
  }
  func.func @transform_0(%arg0: i32, %arg1: i32) -> (i32, i32, i32) {
    %c0_i32 = arith.constant 0 : i32
    %c0_i32_0 = arith.constant 0 : i32
    return %arg0, %c0_i32, %arg1 : i32, i32, i32
  }
  func.func @transform_1(%arg0: i32, %arg1: i32) -> (i32, i32, i32) {
    %c0_i32 = arith.constant 0 : i32
    %c0_i32_0 = arith.constant 0 : i32
    return %arg0, %c0_i32, %arg1 : i32, i32, i32
  }
  func.func @transform_2(%arg0: i32, %arg1: i32) -> (i32, i32) {
    %c0_i32 = arith.constant 0 : i32
    %c0_i32_0 = arith.constant 0 : i32
    %c0_i32_1 = arith.constant 0 : i32
    return %c0_i32, %c0_i32_0 : i32, i32
  }
  func.func @transform_3(%arg0: i32, %arg1: i32) -> (i32, i32) {
    %c0_i32 = arith.constant 0 : i32
    %c0_i32_0 = arith.constant 0 : i32
    %c0_i32_1 = arith.constant 0 : i32
    return %c0_i32, %c0_i32_0 : i32, i32
  }
  func.func @transform_4(%arg0: i32, %arg1: i32) -> (i32, i32, i32) {
    %c0_i32 = arith.constant 0 : i32
    %c0_i32_0 = arith.constant 0 : i32
    return %arg0, %c0_i32, %arg1 : i32, i32, i32
  }
}

</mosaic_0001>

<bundles_post_ra>
// kernel: tpu_custom_call.1
= control target key start
LH: loop header
LB: loop body
LE: loop exit
PB: predicated region body
PF: predicated region fallthrough
CT: control target
= control target key end

     0   :  { %s1395_s0 = inlined_call_operand.hbm [shape: f32[2,32,256], index: 0, kind: input, shape index: {}]   ;;  %s1396_s1 = inlined_call_operand.hbm [shape: f32[2,64,256], index: 1, kind: input, shape index: {}]   ;;  %s1397_s2 = inlined_call_operand.hbm [shape: f32[32,64], index: 2, kind: input, shape index: {}]   ;;  %s1398_s3 = inlined_call_operand.hbm [shape: f32[32,1], index: 3, kind: input, shape index: {}]   ;;  %s1399_s4 = inlined_call_operand.hbm [shape: f32[2,64,256], index: 4, kind: output, shape index: {}]  }
   0x1   :  { %1404 = sst [smem:[#allocation17_spill]] %s1395_s0 }
   0x2   :  { %1405 = sst [smem:[#allocation18_spill]] %s1397_s2 }
   0x3   :  { %1406 = sst [smem:[#allocation19_spill]] %s1398_s3 }
   0x4   :  { %9 = vsyncpa [#allocation3], 0 }
   0x5   :  { %11 = vsyncpa [#allocation3 + $0x1], 0 }
   0x6   :  { %12 = vsyncpa [#allocation6], 0 }
   0x7   :  { %14 = vsyncpa [#allocation6 + $0x1], 0 }
   0x8   :  { %15 = vsyncpa [#allocation9], 0 }
   0x9   :  { %16 = vsyncpa [#allocation4], 0 }
   0xa   :  { %18 = vsyncpa [#allocation4 + $0x1], 0  ;;  %s1038_s15 = smov 0   ;;  %s1040_s16 = smov 0  }
   0xb   :  { %s1042_s17 = smov 0   ;;  %s1044_s18 = smov 0  }
   0xc   :  { %s1046_s19 = smov 0   ;;  %s1048_s20 = smov 0  }
   0xd LB: > { %s1069_s21 = sadd.s32 4294967295, %s998_s20   ;;  %s637_s22 = sadd.s32 4294967294, %s998_s20   ;;  %s998_s20 = sphi %s1048_s20, %s24_s20   ;;  %s994_s19 = sphi %s1046_s19, %s1431_s19   ;;  %s990_s18 = sphi %s1044_s18, %s1430_s18   ;;  %s986_s17 = sphi %s1042_s17, %s1429_s17   ;;  %s982_s16 = sphi %s1040_s16, %s1428_s16   ;;  %s978_s15 = sphi %s1038_s15, %s1427_s15  }
   0xe   : > { %p58_p0 = scmp.ne.s32.totalorder %s982_s16, %s978_s15  ;;  %p1400_p1 = scmp.eq.s32.totalorder %s1069_s21, 0 }
   0xf   : > { %p160_p3 = scmp.eq.s32.totalorder %s637_s22, 1  ;;  %p638_p5 = scmp.ge.s32.totalorder %s998_s20, 1 }
  0x10   : > { %p1078_p4 = por %p1400_p1, %p58_p0  ;;  %p167_p7 = scmp.lt.s32.totalorder %s998_s20, 3 }
  0x11   : > { %p1083_p6 = por %p160_p3, %p58_p0  ;;  %s1000_s26 = smov [#allocation7]  }
  0x12   : > { %s1407_s23 = scalar_select %p1078_p4, 1, 0 }
  0x13   : > { %s1408_s24 = scalar_select %p1083_p6, 1, 0 }
  0x14   : > { %p1088_p8 = pnand %p638_p5, %p167_p7  ;;  %s179_s27 = sshll.u32 %s1000_s26, 4  ;;  %s1092_s27 = int_to_ptr.vmem [resolvable:$true] %s179_s27 }
  0x15   : > { %s1001_s29 = smov [#allocation8]   ;;  %s1411_s2 = sld [smem:[#allocation18_spill]] }
  0x16   : > { %p704_p9 = pneg %p1088_p8  ;;  %s192_s30 = sshll.u32 %s1001_s29, 4  ;;  %s1103_s30 = int_to_ptr.vmem [resolvable:$true] %s192_s30 }
  0x18   : > { %p1099_p11 = pnand %p704_p9, %p1400_p1 }
  0x1a   : > { %p790_p13 = pneg %p1099_p11 }
  0x1b   : > { %s788_s7 = scalar_lea.hbm %s1411_s2, 512 }
  0x1c   : > { %p789_p12 = scmp.ne.s32.totalorder %s1411_s2, %s788_s7  ;;  %p795_p5 = scmp.lt.u32.totalorder %s788_s7, %s1411_s2 }
  0x1e   : > { %p791_p0 = pnand %p790_p13, %p789_p12 }
  0x20   : > { %p792_p3 = pneg %p791_p0 }
  0x22   : > { %p797_p7 = pnand %p795_p5, %p792_p3 }
  0x24   : > { %800 = shalt.err (!%p797_p7)
}
  0x25   : > { %s801_s12 = scalar_lea.vmem %s1092_s27, 512  ;;  %p809_p2 = scmp.lt.s32.totalorder %s1092_s27, %s1092_s27 }
  0x26   : > { %p802_p9 = scmp.ne.s32.totalorder %s1092_s27, %s801_s12  ;;  %p810_p12 = scmp.lt.s32.totalorder %s801_s12, %s801_s12 }
  0x28   : > { %p804_p10 = pnand %p802_p9, %p790_p13  ;;  %p811_p0 = por %p810_p12, %p809_p2 }
  0x2a   : > { %p805_p1 = pneg %p804_p10 }
  0x2c   : > { %p812_p6 = pnand %p811_p0, %p805_p1 }
  0x2e   : > { %815 = shalt.err (!%p812_p6)
}
  0x2f   : > { %s1002_s13 = smov 128   ;;  %s1003_s14 = smov 8  }
  0x30   : > { %707 = dma.hbm_to_vmem [thread:$0]  (!%p1099_p11), %s1411_s2, 512, %s1092_s27, [#allocation6], %s1002_s13, %s1002_s13, %s1003_s14  }
  0x31   : > { %s1412_s3 = sld [smem:[#allocation19_spill]] }
  0x37   : > { %s816_s6 = scalar_lea.hbm %s1412_s3, 512 }
  0x38   : > { %p817_p2 = scmp.ne.s32.totalorder %s1412_s3, %s816_s6  ;;  %p823_p10 = scmp.lt.u32.totalorder %s816_s6, %s1412_s3 }
  0x3a   : > { %p819_p1 = pnand %p817_p2, %p790_p13 }
  0x3c   : > { %p820_p6 = pneg %p819_p1 }
  0x3e   : > { %p825_p3 = pnand %p823_p10, %p820_p6 }
  0x40   : > { %828 = shalt.err (!%p825_p3)
}
  0x41   : > { %s829_s27 = scalar_lea.vmem %s1103_s30, 512  ;;  %p837_p12 = scmp.lt.s32.totalorder %s1103_s30, %s1103_s30 }
  0x42   : > { %p830_p5 = scmp.ne.s32.totalorder %s1103_s30, %s829_s27  ;;  %p838_p0 = scmp.lt.s32.totalorder %s829_s27, %s829_s27 }
  0x44   : > { %p832_p7 = pnand %p830_p5, %p790_p13  ;;  %p839_p2 = por %p838_p0, %p837_p12 }
  0x46   : > { %p833_p9 = pneg %p832_p7 }
  0x48   : > { %p840_p1 = pnand %p839_p2, %p833_p9 }
  0x4a   : > { %843 = shalt.err (!%p840_p1)
}
  0x4b   : > { %710 = dma.hbm_to_vmem [thread:$0]  (!%p1099_p11), %s1412_s3, 512, %s1103_s30, [#allocation9], %s1002_s13, %s1002_s13, %s1003_s14  }
  0x4c   : > { %s36_s22 = sadd.s32 1, %s994_s19  ;;  %s45_s26 = sadd.s32 1, %s986_s17 }
  0x4d   : > { %p38_p13 = scmp.ge.s32.totalorder %s36_s22, 2  ;;  %p52_p6 = scmp.ne.s32.totalorder %s986_s17, %s982_s16 }
  0x4e   : > { %p53_p10 = scmp.eq.s32.totalorder %s998_s20, 0  ;;  %p724_p3 = scmp.lt.s32.totalorder %s998_s20, 2 }
  0x4f   : > { %s1433_s22 = smov (%p38_p13, %s36_s22), 0  ;;  %p1414_p7 = scmp.eq.s32.totalorder %s1069_s21, 1 }
  0x50   : > { %1413 = sst [smem:[#allocation16_spill]] %s1433_s22  ;;  %p54_p5 = por %p53_p10, %p52_p6 }
  0x51   : > { %p1167_p9 = por %p1414_p7, %p52_p6  ;;  %s40_s29 = ssub.s32 %s994_s19, %s1433_s22 }
  0x52   : > { %s1174_s5 = sand.u32 1, %s986_s17   ;;  %p43_p11 = scmp.eq.s32.totalorder %s40_s29, 0 }
  0x53   : > { %s1415_s28 = scalar_select %p1167_p9, 1, 0 }
  0x54   : > { %s642_s30 = sshll.u32 %s1174_s5, 6  ;;  %s663_s13 = sshll.u32 %s994_s19, 10 }
  0x55   : > { %s1179_s14 = scalar_select %p43_p11, %s986_s17, %s45_s26  }
  0x56   : > { %s1416_s0 = sld [smem:[#allocation17_spill]]  ;;  %s210_s9 = scalar_lea.vmem [#allocation2], %s642_s30 }
  0x57   : > { %s219_s10 = sshll.u32 %s210_s9, 4  ;;  %p1188_p12 = pnand %p724_p3, %p54_p5  ;;  %s1192_s10 = int_to_ptr.vmem [resolvable:$true] %s219_s10 }
  0x58   : > { %s207_s11 = scalar_lea.sflag [#allocation3], %s1174_s5 }
  0x59   : > { %p846_p2 = pneg %p1188_p12 }
  0x5c   : > { %s1184_s8 = scalar_lea.hbm %s1416_s0, %s663_s13  ;;  %s849_s30 = scalar_lea.hbm %s1416_s0, 2048 }
  0x5d   : > { %s844_s12 = scalar_lea.hbm %s1184_s8, 1024  ;;  %p850_p6 = scmp.lt.u32.totalorder %s1184_s8, %s1416_s0 }
  0x5e   : > { %p845_p0 = scmp.ne.s32.totalorder %s1184_s8, %s844_s12  ;;  %p851_p10 = scmp.lt.u32.totalorder %s849_s30, %s844_s12 }
  0x5f   : > { %p853_p5 = scmp.lt.u32.totalorder %s844_s12, %s1184_s8 }
  0x60   : > { %p847_p1 = pnand %p846_p2, %p845_p0  ;;  %p852_p3 = por %p851_p10, %p850_p6 }
  0x62   : > { %p848_p13 = pneg %p847_p1  ;;  %p854_p7 = por %p853_p5, %p852_p3 }
  0x64   : > { %p855_p11 = pnand %p854_p7, %p848_p13 }
  0x66   : > { %858 = shalt.err (!%p855_p11)
}
  0x67   : > { %s859_s7 = scalar_lea.vmem %s1192_s10, 1024  ;;  %s1004_s9 = smov [#allocation2]  }
  0x68   : > { %p860_p0 = scmp.ne.s32.totalorder %s1192_s10, %s859_s7  ;;  %s864_s26 = sshll.u32 %s1004_s9, 4  ;;  %s865_s26 = int_to_ptr.vmem [resolvable:$false] %s864_s26 }
  0x69   : > { %s866_s29 = scalar_lea.vmem %s865_s26, 2048  ;;  %p867_p4 = scmp.lt.s32.totalorder %s1192_s10, %s865_s26 }
  0x6a   : > { %p862_p1 = pnand %p860_p0, %p846_p2  ;;  %p868_p6 = scmp.lt.s32.totalorder %s866_s29, %s859_s7 }
  0x6c   : > { %p863_p9 = pneg %p862_p1  ;;  %p869_p10 = por %p868_p6, %p867_p4 }
  0x6e   : > { %p870_p3 = pnand %p869_p10, %p863_p9 }
  0x70   : > { %873 = shalt.err (!%p870_p3)
}
  0x71   : > { %s1005_s12 = smov 256   ;;  %s1006_s30 = smov 16  }
  0x72   : > { %714 = dma.hbm_to_vmem [thread:$0]  (!%p1188_p12), %s1184_s8, 1024, %s1192_s10, %s207_s11, %s1005_s12, %s1005_s12, %s1006_s30  }
  0x73   : > { %s229_s13 = sand.u32 1, %s998_s20   ;;  %s645_s6 = sshll.u32 %s1174_s5, 7 }
  0x74   : > { %s664_s7 = sshll.u32 %s994_s19, 11  ;;  %s233_s9 = scalar_lea.vmem [#allocation5], %s645_s6 }
  0x75   : > { %s242_s26 = sshll.u32 %s233_s9, 4  ;;  %s1231_s2 = scalar_lea.hbm %s1396_s1, %s664_s7  ;;  %s1233_s26 = int_to_ptr.vmem [resolvable:$true] %s242_s26 }
  0x76   : > { %s1235_s3 = scalar_lea.sflag [#allocation6], %s229_s13  ;;  %s874_s22 = scalar_lea.hbm %s1231_s2, 2048 }
  0x77   : > { %p875_p4 = scmp.ne.s32.totalorder %s1231_s2, %s874_s22  ;;  %s879_s0 = scalar_lea.hbm %s1396_s1, 4096 }
  0x78   : > { %p880_p5 = scmp.lt.u32.totalorder %s1231_s2, %s1396_s1  ;;  %p881_p7 = scmp.lt.u32.totalorder %s879_s0, %s874_s22 }
  0x79   : > { %p877_p9 = pnand %p875_p4, %p846_p2  ;;  %p883_p0 = scmp.lt.u32.totalorder %s874_s22, %s1231_s2 }
  0x7a   : > { %p882_p11 = por %p881_p7, %p880_p5 }
  0x7b   : > { %p878_p13 = pneg %p877_p9 }
  0x7c   : > { %p884_p1 = por %p883_p0, %p882_p11 }
  0x7e   : > { %p885_p6 = pnand %p884_p1, %p878_p13 }
  0x80   : > { %888 = shalt.err (!%p885_p6)
}
  0x81   : > { %s889_s13 = scalar_lea.vmem %s1233_s26, 2048  ;;  %s1007_s6 = smov [#allocation5]  }
  0x82   : > { %p890_p10 = scmp.ne.s32.totalorder %s1233_s26, %s889_s13  ;;  %s894_s7 = sshll.u32 %s1007_s6, 4  ;;  %s895_s7 = int_to_ptr.vmem [resolvable:$false] %s894_s7 }
  0x83   : > { %s896_s9 = scalar_lea.vmem %s895_s7, 4096  ;;  %p897_p9 = scmp.lt.s32.totalorder %s1233_s26, %s895_s7 }
  0x84   : > { %p892_p3 = pnand %p890_p10, %p846_p2  ;;  %p898_p5 = scmp.lt.s32.totalorder %s896_s9, %s889_s13 }
  0x86   : > { %p893_p4 = pneg %p892_p3  ;;  %p899_p7 = por %p898_p5, %p897_p9 }
  0x88   : > { %p900_p11 = pnand %p899_p7, %p893_p4 }
  0x8a   : > { %903 = shalt.err (!%p900_p11)
}
  0x8b   : > { %717 = dma.hbm_to_vmem [thread:$0]  (!%p1188_p12), %s1231_s2, 2048, %s1233_s26, %s1235_s3, %s1005_s12, %s1005_s12, %s1006_s30  }
  0x8c   : > { %254 = sbr.rel (%p1088_p8) target bundleno = 412 (0x19c), region = 36  ;;  %s1267_s22 = sand.u32 (!%p1088_p8), 1, %s982_s16  }
  0x8d   : > { %s649_s29 = sshll.u32 (!%p1088_p8), %s1267_s22, 6  ;;  %s257_s5 = scalar_lea.sflag (!%p1088_p8), [#allocation3], %s1267_s22 }
  0x8e   : > { %s1271_s8 = scalar_lea.vmem (!%p1088_p8), [#allocation2], %s649_s29  ;;  %p1418_p2 = scmp.ne.s32.totalorder (!%p1088_p8), %s1407_s23, 0 }
  0x93   : > { %957 = dma.done.wait (%p1418_p2), %s257_s5, 1024  }
  0x94   : > { %959 = vsyncadd (%p1418_p2), %s257_s5, 4294966272  ;;  %s265_s2 = sand.u32 1, %s1069_s21   ;;  %s650_s3 = sshll.u32 %s1267_s22, 7 }
  0x95   : > { %s266_s25 = scalar_lea.sflag [#allocation6], %s265_s2  ;;  %s1281_s27 = scalar_lea.vmem [#allocation5], %s650_s3 }
  0x96   : > { %961 = dma.done.wait (%p1418_p2), %s266_s25, 2048  }
  0x97   : > { %963 = vsyncadd (%p1418_p2), %s266_s25, 4294965248  ;;  %p1419_p8 = scmp.eq.s32.totalorder %s1069_s21, 0 }
  0x99   : > { %965 = dma.done.wait (%p1419_p8), [#allocation6], 512   ;;  %p1420_p12 = pmov %p1419_p8 }
  0x9a   : > { %p1421_p13 = pmov %p1419_p8 }
  0x9b   : > { %967 = vsyncadd (%p1420_p12), [#allocation6], 4294966784 }
  0x9c   : > { %969 = dma.done.wait (%p1421_p13), [#allocation9], 512   ;;  %p1422_p0 = pmov %p1419_p8 }
  0x9d   : > { %v1008_v0 = vmov 0.0   ;;  %v1009_v1 = vmov 0   ;;  %v331_v2 = vld [vmem:[%s1281_s27 + $0x8] sm:$0xff]  ;;  %v333_v3 = vld [vmem:[%s1281_s27 + $0x18] sm:$0xff]  ;;  %v330_v4 = vld [vmem:[%s1281_s27] sm:$0xff]  ;;  %vm370_vm0 = vcmask 523264  }
  0x9e   : > { %971 = vsyncadd (%p1422_p0), [#allocation9], 4294966784  ;;  %447 = vmatprep.mubr.f32.mxu0 %v1008_v0  ;;  %459 = vmatprep.mubr.f32.mxu1 %v1008_v0  ;;  %v666_v5 = vpack.c.bf16 %v333_v3, %v331_v2  ;;  %v332_v6 = vld [vmem:[%s1281_s27 + $0x10] sm:$0xff]  ;;  %v335_v7 = vld [vmem:[%s1281_s27 + $0x28] sm:$0xff]  ;;  %s1319_s21 = scalar_lea.vmem [#allocation10], %s650_s3  ;;  %s665_s23 = sshll.u32 %s990_s18, 11 }
  0x9f   : > { %787 = vset.pattern.permute.xlu1 %v1009_v1  ;;  %786 = vset.pattern.permute.xlu0 %v1009_v1  ;;  %v337_v8 = vld [vmem:[%s1281_s27 + $0x38] sm:$0xff]  ;;  %v668_v9 = vpack.c.bf16 %v332_v6, %v330_v4  ;;  %v334_v11 = vld [vmem:[%s1281_s27 + $0x20] sm:$0xff]  ;;  %v336_v12 = vld [vmem:[%s1281_s27 + $0x30] sm:$0xff]  ;;  %s504_s12 = sshll.u32 %s1319_s21, 4  ;;  %s1340_s26 = scalar_lea.hbm %s1399_s4, %s665_s23  ;;  %s1342_s12 = int_to_ptr.vmem [resolvable:$true] %s504_s12 }
  0xa0   : > { %v670_v10 = vpack.c.bf16 %v337_v8, %v335_v7  ;;  %v339_v13 = vld [vmem:[%s1281_s27 + $0x48] sm:$0xff]  ;;  %667 = vmatprep.subr.bf16.mxu0 %v666_v5  ;;  %682 = vmatprep.subr.bf16.mxu1 %v666_v5  ;;  %v341_v14 = vld [vmem:[%s1281_s27 + $0x58] sm:$0xff]  ;;  %v672_v15 = vpack.c.bf16 %v336_v12, %v334_v11  ;;  %v338_v17 = vld [vmem:[%s1281_s27 + $0x40] sm:$0xff]  ;;  %s489_s0 = scalar_lea.sflag [#allocation4], %s1267_s22  ;;  %s904_s10 = scalar_lea.vmem %s1342_s12, 2048 }
  0xa1   : > { %669 = vmatpush1.bf16.msra.mxu0 %v668_v9  ;;  %686 = vmatpush1.bf16.msra.mxu1 %v668_v9  ;;  %v674_v16 = vpack.c.bf16 %v341_v14, %v339_v13  ;;  %v340_v18 = vld [vmem:[%s1281_s27 + $0x50] sm:$0xff]  ;;  %v343_v19 = vld [vmem:[%s1281_s27 + $0x68] sm:$0xff]  ;;  %v345_v20 = vld [vmem:[%s1281_s27 + $0x78] sm:$0xff]  ;;  %p905_p1 = scmp.ne.s32.totalorder %s1342_s12, %s904_s10  ;;  %p1423_p6 = scmp.ne.s32.totalorder %s1415_s28, 0 }
  0xa2   : > { %671 = vmatprep.subr.bf16.mxu0 %v670_v10  ;;  %683 = vmatprep.subr.bf16.mxu1 %v670_v10  ;;  %v348_v21 = vld [vmem:[#allocation8 + $0x10] sm:$0xff]  ;;  %v346_v22 = vld [vmem:[#allocation8] sm:$0xff]  ;;  %v676_v23 = vpack.c.bf16 %v340_v18, %v338_v17  ;;  %v349_v24 = vld [vmem:[#allocation8 + $0x18] sm:$0xff]  ;;  %v678_v25 = vpack.c.bf16 %v345_v20, %v343_v19  ;;  %s1010_s11 = smov [#allocation10]  }
  0xa3   : > { %362 = vperm.xlu1 %787, %v348_v21   ;;  %v342_v26 = vld [vmem:[%s1281_s27 + $0x60] sm:$0xff]  ;;  %v344_v27 = vld [vmem:[%s1281_s27 + $0x70] sm:$0xff]  ;;  %352 = vperm.xlu0 %786, %v346_v22   ;;  %v347_v28 = vld [vmem:[#allocation8 + $0x8] sm:$0xff]  ;;  %p906_p10 = pnand %p905_p1, %p1423_p6  ;;  %s908_s13 = sshll.u32 %s1010_s11, 4  ;;  %s909_s13 = int_to_ptr.vmem [resolvable:$false] %s908_s13 }
  0xa4   : > { %v680_v29 = vpack.c.bf16 %v344_v27, %v342_v26  ;;  %v326_v30 = vld [vmem:[#allocation7] sm:$0xff]  ;;  %v328_v31 = vld [vmem:[#allocation7 + $0x10] sm:$0xff]  ;;  %v327_v32 = vld [vmem:[#allocation7 + $0x8] sm:$0xff]  ;;  %s910_s6 = scalar_lea.vmem %s909_s13, 4096  ;;  %p911_p4 = scmp.lt.s32.totalorder %s1342_s12, %s909_s13 }
  0xa5   : > { %673 = vmatpush1.bf16.msra.mxu0 %v672_v15  ;;  %687 = vmatpush1.bf16.msra.mxu1 %v672_v15  ;;  %v329_v33 = vld [vmem:[#allocation7 + $0x18] sm:$0xff]  ;;  %v310_v34 = vld [vmem:[%s1271_s8] sm:$0xff]  ;;  %v311_v35 = vld [vmem:[%s1271_s8 + $0x8] sm:$0xff]  ;;  %p907_p3 = pneg %p906_p10  ;;  %p912_p9 = scmp.lt.s32.totalorder %s910_s6, %s904_s10 }
  0xa6   : > { %675 = vmatprep.subr.bf16.mxu0 %v674_v16  ;;  %684 = vmatprep.subr.bf16.mxu1 %v674_v16  ;;  %v312_v36 = vld [vmem:[%s1271_s8 + $0x10] sm:$0xff]  ;;  %v313_v37 = vld [vmem:[%s1271_s8 + $0x18] sm:$0xff]  ;;  %v314_v38 = vld [vmem:[%s1271_s8 + $0x20] sm:$0xff]  ;;  %318 = vst [vmem:[%s1319_s21] sm:$0xff] %v310_v34 }
  0xa7   : > { %367 = vperm.xlu1 %787, %v349_v24   ;;  %357 = vperm.xlu0 %786, %v347_v28   ;;  %v315_v39 = vld [vmem:[%s1271_s8 + $0x28] sm:$0xff]  ;;  %319 = vst [vmem:[%s1319_s21 + $0x8] sm:$0xff] %v311_v35  ;;  %320 = vst [vmem:[%s1319_s21 + $0x10] sm:$0xff] %v312_v36  ;;  %v316_v40 = vld [vmem:[%s1271_s8 + $0x30] sm:$0xff]  ;;  %p913_p5 = por %p912_p9, %p911_p4 }
  0xa8   : > { %v317_v41 = vld [vmem:[%s1271_s8 + $0x38] sm:$0xff]  ;;  %321 = vst [vmem:[%s1319_s21 + $0x18] sm:$0xff] %v313_v37  ;;  %322 = vst [vmem:[%s1319_s21 + $0x20] sm:$0xff] %v314_v38 }
  0xa9   : > { %677 = vmatpush1.bf16.msra.mxu0 %v676_v23  ;;  %688 = vmatpush1.bf16.msra.mxu1 %v676_v23  ;;  %323 = vst [vmem:[%s1319_s21 + $0x28] sm:$0xff] %v315_v39  ;;  %324 = vst [vmem:[%s1319_s21 + $0x30] sm:$0xff] %v316_v40  ;;  %p914_p7 = pnand %p913_p5, %p907_p3 }
  0xaa   : > { %679 = vmatprep.subr.bf16.mxu0 %v678_v25  ;;  %685 = vmatprep.subr.bf16.mxu1 %v678_v25  ;;  %325 = vst [vmem:[%s1319_s21 + $0x38] sm:$0xff] %v317_v41 }
  0xad   : > { %681 = vmatpush1.bf16.msra.mxu0 %v680_v29  ;;  %689 = vmatpush1.bf16.msra.mxu1 %v680_v29 }
  0xb0   : > { %654 = vmatmul.mubr.msk.f32.vlgmr.msra.gmra.mrb[0].mxu0 %vm370_vm0, %v326_v30  ;;  %656 = vmatmul.mubr.msk.f32.vlgmr.msra.gmra.mrb[0].mxu1 %vm370_vm0, %v328_v31 }
  0xb1   : > { %453 = vmatprep.mubr.f32.mxu0 %v1008_v0  ;;  %465 = vmatprep.mubr.f32.mxu1 %v1008_v0 }
  0xb4   : > { %655 = vmatmul.mubr.msk.f32.gmra.mrb[2].mxu0 %vm370_vm0, %v327_v32  ;;  %657 = vmatmul.mubr.msk.f32.gmra.mrb[2].mxu1 %vm370_vm0, %v329_v33 }
 0x122   : > { %v363_v42 = vpop.permute.xlu1 %362  ;;  %v353_v43 = vpop.permute.xlu0 %352 }
 0x126   : > { %v368_v54 = vpop.permute.xlu1 %367  ;;  %v358_v55 = vpop.permute.xlu0 %357 }
 0x183   : > { %v449_v44 = vpop.f32.mrb[0].mxu0  ;;  %v461_v45 = vpop.f32.mrb[0].mxu1 }
 0x184   : > { %v450_v46 = vadd.f32 %v449_v44, %v353_v43  ;;  %v462_v47 = vadd.f32 %v461_v45, %v363_v42  ;;  %v451_v48 = vpop.f32.mrb[1].mxu0  ;;  %v463_v49 = vpop.f32.mrb[1].mxu1 }
 0x185   : > { %v452_v50 = vadd.f32 %v451_v48, %v353_v43  ;;  %v464_v51 = vadd.f32 %v463_v49, %v363_v42 }
 0x186   : > { %v472_v52 = vmax.f32 %v450_v46, 0.0  ;;  %v476_v53 = vmax.f32 %v462_v47, 0.0 }
 0x187   : > { %v473_v56 = vmax.f32 %v452_v50, 0.0  ;;  %v477_v57 = vmax.f32 %v464_v51, 0.0  ;;  %v455_v58 = vpop.f32.mrb[2].mxu0  ;;  %v467_v59 = vpop.f32.mrb[2].mxu1 }
 0x188   : > { %480 = vst [vmem:[%s1319_s21 + $0x40] sm:$0xff] %v472_v52  ;;  %484 = vst [vmem:[%s1319_s21 + $0x60] sm:$0xff] %v476_v53  ;;  %v456_v60 = vadd.f32 %v455_v58, %v358_v55  ;;  %v468_v61 = vadd.f32 %v467_v59, %v368_v54  ;;  %v457_v62 = vpop.f32.mrb[3].mxu0  ;;  %v469_v63 = vpop.f32.mrb[3].mxu1 }
 0x189   : > { %481 = vst [vmem:[%s1319_s21 + $0x48] sm:$0xff] %v473_v56  ;;  %485 = vst [vmem:[%s1319_s21 + $0x68] sm:$0xff] %v477_v57  ;;  %v458_v0 = vadd.f32 %v457_v62, %v358_v55  ;;  %v470_v1 = vadd.f32 %v469_v63, %v368_v54 }
 0x18a   : > { %v474_v2 = vmax.f32 %v456_v60, 0.0  ;;  %v478_v3 = vmax.f32 %v468_v61, 0.0 }
 0x18b   : > { %v475_v4 = vmax.f32 %v458_v0, 0.0  ;;  %v479_v5 = vmax.f32 %v470_v1, 0.0 }
 0x18c   : > { %482 = vst [vmem:[%s1319_s21 + $0x50] sm:$0xff] %v474_v2  ;;  %486 = vst [vmem:[%s1319_s21 + $0x70] sm:$0xff] %v478_v3 }
 0x18d   : > { %483 = vst [vmem:[%s1319_s21 + $0x58] sm:$0xff] %v475_v4  ;;  %487 = vst [vmem:[%s1319_s21 + $0x78] sm:$0xff] %v479_v5 }
 0x18e   : > { %917 = shalt.err (!%p914_p7)
}
 0x18f   : > { %s918_s7 = scalar_lea.hbm %s1340_s26, 2048  ;;  %s922_s5 = scalar_lea.hbm %s1399_s4, 4096 }
 0x190   : > { %p919_p11 = scmp.ne.s32.totalorder %s1340_s26, %s918_s7  ;;  %p923_p12 = scmp.lt.u32.totalorder %s1340_s26, %s1399_s4 }
 0x191   : > { %p924_p13 = scmp.lt.u32.totalorder %s922_s5, %s918_s7  ;;  %p926_p1 = scmp.lt.u32.totalorder %s918_s7, %s1340_s26 }
 0x192   : > { %p920_p2 = pnand %p919_p11, %p1423_p6 }
 0x193   : > { %p925_p0 = por %p924_p13, %p923_p12 }
 0x194   : > { %p921_p8 = pneg %p920_p2 }
 0x195   : > { %p927_p10 = por %p926_p1, %p925_p0 }
 0x197   : > { %p928_p3 = pnand %p927_p10, %p921_p8 }
 0x199   : > { %931 = shalt.err (!%p928_p3)
}
 0x19a   : > { %s1011_s3 = smov 256   ;;  %s1012_s25 = smov 16  }
 0x19b   : > { %702 = dma.vmem_to_hbm [thread:$0]  (%p1423_p6), %s1342_s12, 2048, %s1340_s26, %s489_s0, %s1011_s3, %s1011_s3, %s1012_s25  }
 0x19c PF: > { %s519_s27 = sand.u32 1, %s978_s15   ;;  %p1424_p4 = scmp.ne.s32.totalorder %s1408_s24, 0 }
 0x19d   : > { %p1425_p9 = scmp.ge.s32.totalorder %s998_s20, 2  ;;  %s520_s21 = scalar_lea.sflag [#allocation4], %s519_s27 }
 0x19f   : > { %p719_p5 = pnand %p1425_p9, %p1424_p4 }
 0x1a1   : > { %973 = dma.done.wait (!%p719_p5), %s520_s21, 2048  }
 0x1a2   : > { %975 = vsyncadd (!%p719_p5), %s520_s21, 4294965248  ;;  %s24_s20 = sadd.s32 1, %s998_s20   ;;  %s1426_s28 = sld [smem:[#allocation16_spill]] }
 0x1a3   : > { %p21_p7 = scmp.ge.s32.totalorder %s24_s20, 4   ;;  %s1427_s15 = smov %s982_s16 }
 0x1a4   : > { %s1428_s16 = smov %s986_s17  ;;  %s1429_s17 = smov %s1179_s14 }
 0x1a5   : > { %s1430_s18 = smov %s994_s19  ;;  %23 = sbr.rel (!%p21_p7) target bundleno = 13 (0xd), region = 102 }
 0x1a8   : > { %s1431_s19 = smov %s1426_s28 }
 0x1ac   :  { %525 = vsyncpa [#allocation3], 1 }
 0x1ad   :  { %527 = vsyncpa [#allocation3 + $0x1], 1 }
 0x1ae   :  { %528 = vsyncpa [#allocation6], 1 }
 0x1af   :  { %530 = vsyncpa [#allocation6 + $0x1], 1 }
 0x1b0   :  { %531 = vsyncpa [#allocation9], 1 }
 0x1b1   :  { %532 = vsyncpa [#allocation4], 1 }
 0x1b2   :  { %534 = vsyncpa [#allocation4 + $0x1], 1 }

</bundles_post_ra>
